<compile_context>
chip_gen: v7x
topology: tpu7x:2x2x1
jax: 0.10.0
libtpu: 0.0.40
codegen_flags: <defaults>
</compile_context>

<pallas_src>
import jax
import jax.numpy as jnp
from jax.experimental import pallas as pl
from jax.experimental.pallas import tpu as pltpu


LANE = 128  # TPU lane width


def _round_up(x, m):
    return ((x + m - 1) // m) * m


def _make_mlp_kernel(apply_act):
    """Fused transposed-MLP forward kernel.

    Ref order: (xT_ref, w1, b1, w2, b2, ..., wL, bL, outT_ref).
      xT_ref : (in_dim, block)           -- batch in lanes
      w_i    : (out_i, in_i)             -- PyTorch nn.Linear layout
      b_i    : (out_i, 1)                -- broadcasts along lanes
      outT   : (out_dim, block)
    apply_act: tuple[bool], True -> tanh after that layer.
    """
    n_layers = len(apply_act)

    def kernel(*refs):
        x_ref = refs[0]
        out_ref = refs[-1]
        param_refs = refs[1:-1]
        h = x_ref[...].astype(jnp.float32)                    # (in_dim, block)
        for i in range(n_layers):
            w = param_refs[2 * i][...].astype(jnp.float32)     # (out_i, in_i)
            b = param_refs[2 * i + 1][...].astype(jnp.float32)  # (out_i, 1)
            h = jnp.dot(w, h, preferred_element_type=jnp.float32) + b
            if apply_act[i]:
                h = jnp.tanh(h)
        out_ref[...] = h.astype(out_ref.dtype)

    return kernel


def ffnn_forward(x, params, apply_act, *, block_n=1024):
    """Fused MLP forward pass via pallas_call.

    x:         (B, input_dim) float32
    params:    list of (W_i, b_i) with W_i (out_i, in_i)  [PyTorch layout],
               b_i (out_i, 1)
    apply_act: tuple[bool] per layer (True -> tanh)
    block_n:   lane-tile size over the batch (multiple of 128; 1024 default
               keeps VMEM tiny even on v7x's 64 MiB and is 256-aligned for
               the v6e/v7x MXU).
    """
    B, D = x.shape
    out_dim = params[-1][0].shape[0]
    assert block_n % LANE == 0

    # Pick the lane tile: never default to the full (possibly huge) batch.
    if B <= block_n:
        block = _round_up(B, LANE)
    else:
        block = block_n
    B_pad = _round_up(B, block)

    # Pad batch (zero rows are harmless: they just flow bias+tanh) and go
    # feature-major so batch maps to lanes inside the kernel.
    if B_pad != B:
        x = jnp.pad(x, ((0, B_pad - B), (0, 0)))
    x_t = x.T  # (D, B_pad)

    kernel = _make_mlp_kernel(tuple(apply_act))

    in_specs = [pl.BlockSpec((D, block), lambda i: (0, i))]
    flat_params = []
    for (w, b) in params:
        # Parameters are tiny; every grid step sees the full arrays.
        in_specs.append(pl.BlockSpec(w.shape, lambda i: (0, 0)))
        in_specs.append(pl.BlockSpec(b.shape, lambda i: (0, 0)))
        flat_params.extend([w, b])

    out_spec = pl.BlockSpec((out_dim, block), lambda i: (0, i))

    out_t = pl.pallas_call(
        kernel,
        out_shape=jax.ShapeDtypeStruct((out_dim, B_pad), x.dtype),
        grid_spec=pl.GridSpec(
            grid=(B_pad // block,),
            in_specs=in_specs,
            out_specs=out_spec,
        ),
        compiler_params=pltpu.CompilerParams(
            dimension_semantics=("parallel",),
        ),
    )(x_t, *flat_params)

    # Back to (B, out_dim), dropping batch padding.
    return out_t.T[:B]


def init_linear_params(key, in_dim, out_dim):
    """Deterministic init mimicking nn.Linear default (uniform +/- 1/sqrt(in)).

    Stored in PyTorch layout: W (out, in), b (out, 1).
    """
    kw, kb = jax.random.split(key)
    bound = 1.0 / jnp.sqrt(jnp.float32(in_dim))
    w = jax.random.uniform(kw, (out_dim, in_dim), jnp.float32, -bound, bound)
    b = jax.random.uniform(kb, (out_dim, 1), jnp.float32, -bound, bound)
    return w, b


def reference_forward(x, params, apply_act):
    """Pure-JAX reference (mirrors the PyTorch forward loop)."""
    h = x
    for (w, b), act in zip(params, apply_act):
        h = h @ w.T + b[:, 0]
        if act:
            h = jnp.tanh(h)
    return h


if __name__ == "__main__":
    # FeedForwardNeuralNet(neurons=[4, 32, 32, 2],
    #                      activations=[torch.tanh, torch.tanh, None])
    neurons = [4, 32, 32, 2]
    apply_act = (True, True, False)   # tanh, tanh, None
    batch = 8

    key = jax.random.PRNGKey(0)
    keys = jax.random.split(key, len(neurons))  # last key for x
    params = []
    for i in range(len(neurons) - 1):
        params.append(init_linear_params(keys[i], neurons[i], neurons[i + 1]))

    x = jax.random.normal(keys[-1], (batch, neurons[0]), jnp.float32)

    out = ffnn_forward(x, params, apply_act)
    out = jax.block_until_ready(out)

    ref = reference_forward(x, params, apply_act)
    assert out.shape == (batch, neurons[-1])
    assert jnp.allclose(out, ref, atol=1e-5, rtol=1e-5), "mismatch vs reference"

    # TODO(synk): spectral/weight/Frobenius normalization parametrizations and
    # the autograd-based jacobian/hessian/path helpers are training/analysis
    # features outside the forward hot path; not implemented in-kernel.
    print("KERNEL_OK")
</pallas_src>

<mosaic_0001>
module attributes {stable_mosaic.version = 11 : i64} {
  func.func @kernel(%arg0: i32, %arg1: memref<4x128xf32, #tpu.memory_space<vmem>>, %arg2: memref<32x4xf32, #tpu.memory_space<vmem>>, %arg3: memref<32x1xf32, #tpu.memory_space<vmem>>, %arg4: memref<32x32xf32, #tpu.memory_space<vmem>>, %arg5: memref<32x1xf32, #tpu.memory_space<vmem>>, %arg6: memref<2x32xf32, #tpu.memory_space<vmem>>, %arg7: memref<2x1xf32, #tpu.memory_space<vmem>>, %arg8: memref<2x128xf32, #tpu.memory_space<vmem>>) attributes {dimension_semantics = [#tpu.dimension_semantics<parallel>], iteration_bounds = array<i64: 1>, scalar_prefetch = 0 : i64, scratch_operands = 0 : i64, tpu.core_type = #tpu.core_type<tc>, window_params = [{transform_indices = @transform_0, window_bounds = array<i64: 4, 128>}, {pipeline_mode = #tpu.pipeline_mode<synchronous>, transform_indices = @transform_1, window_bounds = array<i64: 32, 4>}, {pipeline_mode = #tpu.pipeline_mode<synchronous>, transform_indices = @transform_2, window_bounds = array<i64: 32, 1>}, {pipeline_mode = #tpu.pipeline_mode<synchronous>, transform_indices = @transform_3, window_bounds = array<i64: 32, 32>}, {pipeline_mode = #tpu.pipeline_mode<synchronous>, transform_indices = @transform_4, window_bounds = array<i64: 32, 1>}, {pipeline_mode = #tpu.pipeline_mode<synchronous>, transform_indices = @transform_5, window_bounds = array<i64: 2, 32>}, {pipeline_mode = #tpu.pipeline_mode<synchronous>, transform_indices = @transform_6, window_bounds = array<i64: 2, 1>}, {transform_indices = @transform_7, window_bounds = array<i64: 2, 128>}]} {
    %c0 = arith.constant 0 : index
    %c0_0 = arith.constant 0 : index
    %0 = vector.load %arg1[%c0, %c0_0] : memref<4x128xf32, #tpu.memory_space<vmem>>, vector<4x128xf32>
    %c0_1 = arith.constant 0 : index
    %c0_2 = arith.constant 0 : index
    %1 = vector.load %arg2[%c0_1, %c0_2] : memref<32x4xf32, #tpu.memory_space<vmem>>, vector<32x4xf32>
    %c0_3 = arith.constant 0 : index
    %c0_4 = arith.constant 0 : index
    %2 = vector.load %arg3[%c0_3, %c0_4] : memref<32x1xf32, #tpu.memory_space<vmem>>, vector<32x1xf32>
    %cst = arith.constant dense<0.000000e+00> : vector<32x128xf32>
    %3 = tpu.matmul %1, %0, %cst {dimension_numbers = #tpu.dot_dimension_numbers<[1], [0], [0], [1], [0, 0, 1, 1], [], []>} : vector<32x4xf32>, vector<4x128xf32>, vector<32x128xf32> -> vector<32x128xf32>
    %4 = vector.broadcast %2 : vector<32x1xf32> to vector<32x128xf32>
    %5 = arith.addf %3, %4 : vector<32x128xf32>
    %6 = math.tanh %5 : vector<32x128xf32>
    %c0_5 = arith.constant 0 : index
    %c0_6 = arith.constant 0 : index
    %7 = vector.load %arg4[%c0_5, %c0_6] : memref<32x32xf32, #tpu.memory_space<vmem>>, vector<32x32xf32>
    %c0_7 = arith.constant 0 : index
    %c0_8 = arith.constant 0 : index
    %8 = vector.load %arg5[%c0_7, %c0_8] : memref<32x1xf32, #tpu.memory_space<vmem>>, vector<32x1xf32>
    %cst_9 = arith.constant dense<0.000000e+00> : vector<32x128xf32>
    %9 = tpu.matmul %7, %6, %cst_9 {dimension_numbers = #tpu.dot_dimension_numbers<[1], [0], [0], [1], [0, 0, 1, 1], [], []>} : vector<32x32xf32>, vector<32x128xf32>, vector<32x128xf32> -> vector<32x128xf32>
    %10 = vector.broadcast %8 : vector<32x1xf32> to vector<32x128xf32>
    %11 = arith.addf %9, %10 : vector<32x128xf32>
    %12 = math.tanh %11 : vector<32x128xf32>
    %c0_10 = arith.constant 0 : index
    %c0_11 = arith.constant 0 : index
    %13 = vector.load %arg6[%c0_10, %c0_11] : memref<2x32xf32, #tpu.memory_space<vmem>>, vector<2x32xf32>
    %c0_12 = arith.constant 0 : index
    %c0_13 = arith.constant 0 : index
    %14 = vector.load %arg7[%c0_12, %c0_13] : memref<2x1xf32, #tpu.memory_space<vmem>>, vector<2x1xf32>
    %cst_14 = arith.constant dense<0.000000e+00> : vector<2x128xf32>
    %15 = tpu.matmul %13, %12, %cst_14 {dimension_numbers = #tpu.dot_dimension_numbers<[1], [0], [0], [1], [0, 0, 1, 1], [], []>} : vector<2x32xf32>, vector<32x128xf32>, vector<2x128xf32> -> vector<2x128xf32>
    %16 = vector.broadcast %14 : vector<2x1xf32> to vector<2x128xf32>
    %17 = arith.addf %15, %16 : vector<2x128xf32>
    %c0_15 = arith.constant 0 : index
    %c0_16 = arith.constant 0 : index
    %18 = vector.load %arg8[%c0_15, %c0_16] : memref<2x128xf32, #tpu.memory_space<vmem>>, vector<2x128xf32>
    tpu.vector_store %arg8[%c0_15, %c0_16], %17 {strides = array<i32>} : memref<2x128xf32, #tpu.memory_space<vmem>>, vector<2x128xf32>,
    return
  }
  func.func @transform_0(%arg0: i32) -> (i32, i32) {
    %c0_i32 = arith.constant 0 : i32
    %c0_i32_0 = arith.constant 0 : i32
    return %c0_i32, %arg0 : i32, i32
  }
  func.func @transform_1(%arg0: i32) -> (i32, i32) {
    %c0_i32 = arith.constant 0 : i32
    %c0_i32_0 = arith.constant 0 : i32
    %c0_i32_1 = arith.constant 0 : i32
    return %c0_i32, %c0_i32_0 : i32, i32
  }
  func.func @transform_2(%arg0: i32) -> (i32, i32) {
    %c0_i32 = arith.constant 0 : i32
    %c0_i32_0 = arith.constant 0 : i32
    %c0_i32_1 = arith.constant 0 : i32
    return %c0_i32, %c0_i32_0 : i32, i32
  }
  func.func @transform_3(%arg0: i32) -> (i32, i32) {
    %c0_i32 = arith.constant 0 : i32
    %c0_i32_0 = arith.constant 0 : i32
    %c0_i32_1 = arith.constant 0 : i32
    return %c0_i32, %c0_i32_0 : i32, i32
  }
  func.func @transform_4(%arg0: i32) -> (i32, i32) {
    %c0_i32 = arith.constant 0 : i32
    %c0_i32_0 = arith.constant 0 : i32
    %c0_i32_1 = arith.constant 0 : i32
    return %c0_i32, %c0_i32_0 : i32, i32
  }
  func.func @transform_5(%arg0: i32) -> (i32, i32) {
    %c0_i32 = arith.constant 0 : i32
    %c0_i32_0 = arith.constant 0 : i32
    %c0_i32_1 = arith.constant 0 : i32
    return %c0_i32, %c0_i32_0 : i32, i32
  }
  func.func @transform_6(%arg0: i32) -> (i32, i32) {
    %c0_i32 = arith.constant 0 : i32
    %c0_i32_0 = arith.constant 0 : i32
    %c0_i32_1 = arith.constant 0 : i32
    return %c0_i32, %c0_i32_0 : i32, i32
  }
  func.func @transform_7(%arg0: i32) -> (i32, i32) {
    %c0_i32 = arith.constant 0 : i32
    %c0_i32_0 = arith.constant 0 : i32
    return %c0_i32, %arg0 : i32, i32
  }
}

</mosaic_0001>

<bundles_post_ra>
// kernel: tpu_custom_call.1
= control target key start
LH: loop header
LB: loop body
LE: loop exit
PB: predicated region body
PF: predicated region fallthrough
CT: control target
= control target key end

     0   :  { %vm69_vm0 = vcmask 1043456   ;;  %vm56_vm1 = vcmask 31744   ;;  %v509_v5 = vmov 0   ;;  %s632_s0 = inlined_call_operand.vmem [shape: f32[4,128], index: 0, kind: input, shape index: {}]   ;;  %s633_s1 = inlined_call_operand.vmem [shape: f32[32,4], index: 1, kind: input, shape index: {}]   ;;  %s634_s2 = inlined_call_operand.vmem [shape: f32[32,1], index: 2, kind: input, shape index: {}]   ;;  %s635_s3 = inlined_call_operand.vmem [shape: f32[32,32], index: 3, kind: input, shape index: {}]   ;;  %s636_s4 = inlined_call_operand.vmem [shape: f32[32,1], index: 4, kind: input, shape index: {}]   ;;  %s637_s5 = inlined_call_operand.vmem [shape: f32[2,32], index: 5, kind: input, shape index: {}]   ;;  %s638_s6 = inlined_call_operand.vmem [shape: f32[2,1], index: 6, kind: input, shape index: {}]   ;;  %s639_s7 = inlined_call_operand.hbm [shape: f32[2,128], index: 7, kind: output, shape index: {}]  }
   0x1   :  { %v27_v0 = vld [vmem:[%s632_s0] sm:$0xf]  ;;  %v29_v2 = vld [vmem:[%s633_s1 + $0x8] sm:$0xff]  ;;  %v30_v3 = vld [vmem:[%s633_s1 + $0x10] sm:$0xff]  ;;  %467 = vset.pattern.permute.xlu0 %v509_v5  ;;  %468 = vset.pattern.permute.xlu1 %v509_v5 }
   0x2   :  { %v28_v1 = vld [vmem:[%s633_s1] sm:$0xff]  ;;  %415 = vmatprep.subr.msk.mxu0 %vm69_vm0, %v27_v0  ;;  %v34_v6 = vld [vmem:[%s634_s2 + $0x10] sm:$0xff]  ;;  %v31_v7 = vld [vmem:[%s633_s1 + $0x18] sm:$0xff] }
   0x3   :  { %417 = vmatprep.mubr.msk.f32.mxu0 %vm56_vm1, %v28_v1  ;;  %v32_v4 = vld [vmem:[%s634_s2] sm:$0xff]  ;;  %416 = vmatpush3.msk.msra.mxu0 %vm69_vm0, %v27_v0  ;;  %v33_v8 = vld [vmem:[%s634_s2 + $0x8] sm:$0xff] }
   0x4   :  { %418 = vmatmul.mubr.msk.f32.vlgmr.msra.gmra.mrb[0].mxu0 %vm56_vm1, %v29_v2  ;;  %38 = vperm.xlu0 %467, %v32_v4  }
   0x5   :  { %420 = vmatprep.mubr.msk.f32.mxu0 %vm56_vm1, %v30_v3 }
   0x6   :  { %12 = vsyncpa [#allocation3], 0  ;;  %48 = vperm.xlu1 %468, %v34_v6   ;;  %v35_v9 = vld [vmem:[%s634_s2 + $0x18] sm:$0xff]  ;;  %v166_v10 = vld [vmem:[%s636_s4] sm:$0xff]  ;;  %vm190_vm2 = vcmask 261120   ;;  %v510_v37 = vmov 0.0|0.0  }
   0x7   :  { %v167_v11 = vld [vmem:[%s636_s4 + $0x8] sm:$0xff]  ;;  %v168_v12 = vld [vmem:[%s636_s4 + $0x10] sm:$0xff]  ;;  %v169_v13 = vld [vmem:[%s636_s4 + $0x18] sm:$0xff]  ;;  %456 = vmatprep.subr.bf16.mxu0 %v510_v37  ;;  %vm511_vm3 = vmmov 0   ;;  %v512_v38 = vmov 0.0   ;;  %s513_s10 = smov [#allocation2]  }
   0x8   :  { %421 = vmatmul.mubr.msk.f32.gmra.mrb[2].mxu0 %vm56_vm1, %v31_v7  ;;  %43 = vperm.xlu0 %467, %v33_v8   ;;  %v293_v14 = vld [vmem:[%s638_s6] sm:$0x3]  ;;  %v163_v34 = vld [vmem:[%s635_s3 + $0x8] sm:$0xff]  ;;  %v164_v35 = vld [vmem:[%s635_s3 + $0x10] sm:$0xff]  ;;  %s379_s0 = sshll.u32 %s513_s10, 4  ;;  %s380_s0 = int_to_ptr.vmem [resolvable:$true] %s379_s0 }
   0x9   :  { %v162_v15 = vld [vmem:[%s635_s3] sm:$0xff]  ;;  %v165_v36 = vld [vmem:[%s635_s3 + $0x18] sm:$0xff]  ;;  %445 = vmatprep.mubr.msk.f32.mxu0 %vm511_vm3, %v512_v38  ;;  %s485_s11 = scalar_lea.vmem %s380_s0, 32  ;;  %p490_p1 = scmp.lt.s32.totalorder %s380_s0, %s380_s0 }
   0xa   :  { %53 = vperm.xlu1 %468, %v35_v9   ;;  %431 = vmatprep.mubr.msk.f32.mxu1 %vm190_vm2, %v162_v15  ;;  %v292_v57 = vld [vmem:[%s637_s5] sm:$0x3]  ;;  %p486_p0 = scmp.ne.s32.totalorder %s380_s0, %s485_s11  ;;  %p491_p2 = scmp.lt.s32.totalorder %s485_s11, %s485_s11 }
   0xc   :  { %172 = vperm.xlu0 %467, %v166_v10   ;;  %p492_p3 = por %p491_p2, %p490_p1 }
   0xe   :  { %177 = vperm.xlu1 %468, %v167_v11   ;;  %p493_p4 = pnand %p492_p3, %p486_p0 }
  0x10   :  { %182 = vperm.xlu0 %467, %v168_v12  }
  0x12   :  { %187 = vperm.xlu1 %468, %v169_v13  }
  0x14   :  { %296 = vperm.xlu0 %467, %v293_v14  }
  0x83   :  { %v39_v16 = vpop.permute.xlu0 %38 }
  0x85   :  { %v49_v17 = vpop.permute.xlu1 %48 }
  0x87   :  { %v44_v18 = vpop.permute.xlu0 %43 }
  0x89   :  { %v54_v23 = vpop.permute.xlu1 %53 }
  0x8b   :  { %v173_v40 = vpop.permute.xlu0 %172 }
  0x8d   :  { %v178_v39 = vpop.permute.xlu1 %177 }
  0x8f   :  { %v183_v47 = vpop.permute.xlu0 %182 }
  0x91   :  { %v188_v45 = vpop.permute.xlu1 %187 }
  0x93   :  { %v297_v58 = vpop.permute.xlu0 %296 }
  0xd7   :  { %v419_v19 = vpop.f32.mrb[0].mxu0 }
  0xd8   :  { %v145_v20 = vadd.f32 %v419_v19, %v44_v18  ;;  %v139_v21 = vpop.f32.mrb[1].mxu0 }
  0xd9   :  { %v140_v22 = vadd.f32 %v139_v21, %v39_v16 }
  0xda   :  { %469 = vtanh.f32 %v145_v20 }
  0xdb   :  { %471 = vtanh.f32 %v140_v22  ;;  %v422_v24 = vpop.f32.mrb[2].mxu0 }
  0xdc   :  { %v155_v25 = vadd.f32 %v422_v24, %v54_v23  ;;  %v149_v26 = vpop.f32.mrb[3].mxu0 }
  0xdd   :  { %v150_v27 = vadd.f32 %v149_v26, %v49_v17 }
  0xde   :  { %473 = vtanh.f32 %v155_v25 }
  0xdf   :  { %475 = vtanh.f32 %v150_v27 }
  0xe4   :  { %v470_v28 = vpop.eup %469 }
  0xe5   :  { %v472_v29 = vpop.eup %471 }
  0xe6   :  { %v448_v30 = vpack.c.bf16 %v470_v28, %v472_v29 }
  0xe8   :  { %v474_v31 = vpop.eup %473  ;;  %449 = vmatprep.subr.bf16.mxu1 %v448_v30 }
  0xe9   :  { %v476_v32 = vpop.eup %475  ;;  %451 = vmatpush3.bf16.msra.mxu1 %v448_v30 }
  0xea   :  { %v452_v33 = vpack.c.bf16 %v474_v31, %v476_v32 }
  0xec   :  { %453 = vmatprep.subr.bf16.mxu1 %v452_v33 }
  0xed   :  { %455 = vmatpush3.bf16.msra.mxu1 %v452_v33 }
  0xf0   :  { %432 = vmatmul.mubr.msk.f32.vlgmr.msra.gmra.mrb[0].mxu1 %vm190_vm2, %v163_v34 }
  0xf1   :  { %434 = vmatprep.mubr.msk.f32.mxu1 %vm190_vm2, %v164_v35 }
  0xf4   :  { %435 = vmatmul.mubr.msk.f32.gmra.mrb[2].mxu1 %vm190_vm2, %v165_v36 }
 0x1c3   :  { %v433_v41 = vpop.f32.mrb[0].mxu1 }
 0x1c4   :  { %v275_v42 = vadd.f32 %v433_v41, %v178_v39  ;;  %v269_v43 = vpop.f32.mrb[1].mxu1 }
 0x1c5   :  { %v270_v44 = vadd.f32 %v269_v43, %v173_v40 }
 0x1c6   :  { %477 = vtanh.f32 %v275_v42 }
 0x1c7   :  { %479 = vtanh.f32 %v270_v44  ;;  %v436_v46 = vpop.f32.mrb[2].mxu1 }
 0x1c8   :  { %v285_v48 = vadd.f32 %v436_v46, %v188_v45  ;;  %v279_v49 = vpop.f32.mrb[3].mxu1 }
 0x1c9   :  { %v280_v50 = vadd.f32 %v279_v49, %v183_v47 }
 0x1ca   :  { %481 = vtanh.f32 %v285_v48 }
 0x1cb   :  { %483 = vtanh.f32 %v280_v50 }
 0x1d0   :  { %v478_v51 = vpop.eup %477 }
 0x1d1   :  { %v480_v52 = vpop.eup %479 }
 0x1d2   :  { %v457_v53 = vpack.c.bf16 %v478_v51, %v480_v52 }
 0x1d4   :  { %v482_v54 = vpop.eup %481  ;;  %458 = vmatpush3.bf16.msra.mxu0 %v457_v53 }
 0x1d5   :  { %v484_v55 = vpop.eup %483  ;;  %459 = vmatprep.subr.bf16.mxu0 %v510_v37 }
 0x1d6   :  { %v460_v56 = vpack.c.bf16 %v482_v54, %v484_v55 }
 0x1d8   :  { %461 = vmatpush3.bf16.msra.mxu0 %v460_v56 }
 0x1db   :  { %446 = vmatmul.mubr.msk.f32.vlgmr.msra.gmra.mrb[4].mxu0 %vm190_vm2, %v292_v57 }
 0x2ae   :  { %v368_v59 = vpop.f32.mrb[4].mxu0 }
 0x2af   :  { %v369_v60 = vadd.f32 %v368_v59, %v297_v58  ;;  %v447_v61 = vpop.f32.mrb[5].mxu0 }
 0x2b1   :  { %372 = vst [vmem:[#allocation2] sm:$0x3] %v369_v60 }
 0x2b2   :  { %496 = shalt.err (!%p493_p4)
}
 0x2b3   :  { %s497_s5 = scalar_lea.hbm %s639_s7, 32 }
 0x2b4   :  { %p498_p5 = scmp.ne.s32.totalorder %s639_s7, %s497_s5  ;;  %p501_p6 = scmp.lt.u32.totalorder %s497_s5, %s639_s7 }
 0x2b6   :  { %p503_p7 = pnand %p501_p6, %p498_p5 }
 0x2b8   :  { %506 = shalt.err (!%p503_p7)
}
 0x2b9   :  { %382 = dma.vmem_to_hbm [thread:$0]  %s380_s0, 32, %s639_s7, [#allocation3]  }
 0x2ba   :  { %507 = dma.done.wait [#allocation3], 32  }
 0x2bb   :  { %508 = vsyncadd [#allocation3], 4294967264 }
 0x2bc   :  { %386 = vsyncpa [#allocation3], 1 }

</bundles_post_ra>
